<compile_context>
chip_gen: v7x
topology: tpu7x:2x2x1
jax: 0.10.0
libtpu: 0.0.40
codegen_flags: <defaults>
</compile_context>

<pallas_src>
import functools

import jax
import jax.numpy as jnp
from jax import lax
from jax.experimental import pallas as pl
from jax.experimental.pallas import tpu as pltpu

LANE = 128
SUBLANE = 8
TILE = SUBLANE * LANE          # 1024-element granularity of the streaming path
_LOG_CLAMP = -100.0            # torch.nn.BCELoss clamps each log term at -100

# Use the single fused pallas_call whenever every per-scale slab is at most
# this many rows of 128 (worst case 4 slabs * 2048 * 512 B = 4 MiB resident).
_FUSED_MAX_ROWS = 2048
# Streaming tile: 4096 rows = 2 MiB / input / buffer.
_STREAM_BLOCK_ROWS = 4096
_STREAM_VMEM_LIMIT = 32 * 1024 * 1024


# ----------------------------------------------------------------------------
# Element-wise BCE math (used inside kernels, for the ragged tail, and as ref).
# ----------------------------------------------------------------------------
def _bce_terms(p, t):
    p = p.astype(jnp.float32)
    t = t.astype(jnp.float32)
    log_p = jnp.maximum(jnp.log(p), _LOG_CLAMP)
    log_1mp = jnp.maximum(jnp.log(1.0 - p), _LOG_CLAMP)
    return -(t * log_p + (1.0 - t) * log_1mp)


def _self_bce_terms(x):
    # BCE(x, x): single input -> half the HBM traffic of the two-input form.
    x = x.astype(jnp.float32)
    log_x = jnp.maximum(jnp.log(x), _LOG_CLAMP)
    log_1mx = jnp.maximum(jnp.log(1.0 - x), _LOG_CLAMP)
    return -(x * log_x + (1.0 - x) * log_1mx)


def _to_slab(x):
    """Flatten to a zero-padded (rows, 128) lane-dense slab.

    Zero pads contribute exactly 0 to the clamped BCE sum (with p=0, t=0 both
    log terms vanish after the -100 clamp), so no in-kernel masking is needed.
    """
    flat = x.reshape(-1)
    n = flat.size
    rows = pl.cdiv(n, LANE)
    pad = rows * LANE - n
    if pad:
        flat = jnp.pad(flat, (0, pad))
    return flat.reshape(rows, LANE)


# ----------------------------------------------------------------------------
# Fused small path: one pallas_call computes all three reduction sums.
# ----------------------------------------------------------------------------
def _fused_sums_kernel(p0_ref, t0_ref, x1_ref, x2_ref, o_ref):
    # o_ref: (3*SUBLANE, LANE) lane-dense partials; one sublane-aligned row per
    # scale (the wrapper reduces each 8x128 slice to a scalar).
    o_ref[...] = jnp.zeros_like(o_ref)
    o_ref[0:1, :] = _bce_terms(p0_ref[...], t0_ref[...]).sum(axis=0, keepdims=True)
    o_ref[SUBLANE:SUBLANE + 1, :] = _self_bce_terms(x1_ref[...]).sum(
        axis=0, keepdims=True)
    o_ref[2 * SUBLANE:2 * SUBLANE + 1, :] = _self_bce_terms(x2_ref[...]).sum(
        axis=0, keepdims=True)


def _fused_bce_sums(p0, t0, x1, x2):
    vmem = pl.BlockSpec(memory_space=pltpu.MemorySpace.VMEM)
    partials = pl.pallas_call(
        _fused_sums_kernel,
        out_shape=jax.ShapeDtypeStruct((3 * SUBLANE, LANE), jnp.float32),
        in_specs=[vmem, vmem, vmem, vmem],
        out_specs=vmem,
    )(p0, t0, x1, x2)
    return jnp.sum(partials.reshape(3, SUBLANE * LANE), axis=1)  # (3,) sums


# ----------------------------------------------------------------------------
# Streaming large path: tiled reduction over a (rows, 128) slab (rows % 8 == 0).
# ----------------------------------------------------------------------------
def _stream_kernel(*refs, self_bce, block_rows, rows_valid, nblocks):
    if self_bce:
        x_ref, o_ref = refs
        loss = _self_bce_terms(x_ref[...])
    else:
        p_ref, t_ref, o_ref = refs
        loss = _bce_terms(p_ref[...], t_ref[...])

    k = pl.program_id(0)

    @pl.when(k == 0)
    def _():
        o_ref[...] = jnp.zeros_like(o_ref)

    def accumulate(l):
        # Vreg-aligned partial reduce: pure VPU adds into the resident block.
        o_ref[...] += l.reshape(-1, SUBLANE, LANE).sum(axis=0)

    if rows_valid % block_rows == 0:
        accumulate(loss)
    else:
        # Only the last block is partial; keep the steady state mask-free.
        @pl.when(k < nblocks - 1)
        def _():
            accumulate(loss)

        @pl.when(k == nblocks - 1)
        def _():
            # NOTE: jnp.where is a select, so log() on the undefined OOB tail
            # is safe; do not refactor to multiplicative masking.
            ridx = k * block_rows + lax.broadcasted_iota(jnp.int32, loss.shape, 0)
            accumulate(jnp.where(ridx < rows_valid, loss, 0.0))


def _stream_bce_sum(slabs, *, block_rows):
    rows = slabs[0].shape[0]
    self_bce = len(slabs) == 1
    block_rows = min(block_rows, rows)
    assert rows % SUBLANE == 0 and block_rows % SUBLANE == 0
    nblocks = pl.cdiv(rows, block_rows)

    kernel = functools.partial(
        _stream_kernel, self_bce=self_bce, block_rows=block_rows,
        rows_valid=rows, nblocks=nblocks)

    n_elems = rows * LANE
    cost = pl.CostEstimate(
        flops=8 * n_elems,
        transcendentals=2 * n_elems,
        bytes_accessed=len(slabs) * 4 * n_elems + 4 * SUBLANE * LANE)

    in_spec = pl.BlockSpec((block_rows, LANE), lambda k: (k, 0))
    partials = pl.pallas_call(
        kernel,
        out_shape=jax.ShapeDtypeStruct((SUBLANE, LANE), jnp.float32),
        grid_spec=pltpu.PrefetchScalarGridSpec(
            num_scalar_prefetch=0,
            grid=(nblocks,),
            in_specs=[in_spec] * len(slabs),
            out_specs=pl.BlockSpec((SUBLANE, LANE), lambda k: (0, 0)),
        ),
        compiler_params=pltpu.CompilerParams(
            dimension_semantics=("arbitrary",),
            vmem_limit_bytes=_STREAM_VMEM_LIMIT,
        ),
        cost_estimate=cost,
    )(*slabs)
    return jnp.sum(partials)


def _bce_mean_large(pred, target=None, *, block_rows=_STREAM_BLOCK_ROWS):
    """mean clamped BCE; target=None means BCE(pred, pred) (single-input kernel)."""
    arrays = (pred,) if target is None else (pred, target)
    n = pred.size
    main = (n // TILE) * TILE
    total = jnp.float32(0.0)
    if main > 0:
        rows = main // LANE                       # multiple of SUBLANE
        slabs = tuple(a.reshape(-1)[:main].reshape(rows, LANE) for a in arrays)
        total = total + _stream_bce_sum(slabs, block_rows=block_rows)
    if main < n:
        # Ragged tail (< 1024 elems): plain JAX, avoids a padded HBM copy.
        tails = tuple(a.reshape(-1)[main:] for a in arrays)
        if target is None:
            total = total + jnp.sum(_self_bce_terms(tails[0]))
        else:
            total = total + jnp.sum(_bce_terms(tails[0], tails[1]))
    return total / jnp.float32(n)


# ----------------------------------------------------------------------------
# Module forward
# ----------------------------------------------------------------------------
def discriminator_loss_pallas(pre, val):
    # Matches the PyTorch reference exactly: median_rf / big_rf are
    # BCELoss(val[i], val[i]); pre[1]/pre[2] are never used by the reference.
    assert pre[0].shape == val[0].shape, "BCELoss requires matching shapes"
    n0, n1, n2 = pre[0].size, val[1].size, val[2].size

    max_rows = max(pl.cdiv(n0, LANE), pl.cdiv(n1, LANE), pl.cdiv(n2, LANE))
    if max_rows <= _FUSED_MAX_ROWS:
        # Dominant real case: one fused pallas_call for all three sums.
        sums = _fused_bce_sums(_to_slab(pre[0]), _to_slab(val[0]),
                               _to_slab(val[1]), _to_slab(val[2]))
        losses = sums / jnp.array([n0, n1, n2], jnp.float32)
    else:
        losses = jnp.stack([
            _bce_mean_large(pre[0], val[0]),
            _bce_mean_large(val[1]),           # single-input self-BCE kernel
            _bce_mean_large(val[2]),
        ])

    # Exp-softmax weighting over 3 scalars: plain JAX (not worth a kernel).
    w = jnp.exp(losses)
    w = w / jnp.sum(w)
    return jnp.sum(w * losses)


def discriminator_loss_ref(pre, val):
    def bce(p, t):
        return jnp.mean(_bce_terms(p, t))
    losses = jnp.stack([bce(pre[0], val[0]), bce(val[1], val[1]),
                        bce(val[2], val[2])])
    w = jnp.exp(losses)
    w = w / jnp.sum(w)
    return jnp.sum(w * losses)


if __name__ == "__main__":
    key = jax.random.PRNGKey(0)
    ks = jax.random.split(key, 6)

    def probs(k, shape):  # BCE inputs must be probabilities in (0, 1)
        return jax.nn.sigmoid(jax.random.normal(k, shape, dtype=jnp.float32))

    # Multi-scale discriminator outputs (NCHW probability maps).
    pre = [probs(ks[0], (2, 1, 16, 16))]
    val = [
        probs(ks[1], (2, 1, 16, 16)),   # small receptive field
        probs(ks[2], (2, 1, 12, 12)),   # median (ragged -> zero-pad path)
        probs(ks[3], (2, 1, 8, 8)),     # big
    ]

    out = jax.block_until_ready(discriminator_loss_pallas(pre, val))
    ref = discriminator_loss_ref(pre, val)
    assert jnp.allclose(out, ref, rtol=1e-5, atol=1e-6), (out, ref)

    # Also exercise the streaming large path: multi-block grid, gated last-block
    # masking, ragged JAX tail, both the two-input and single-input kernels.
    big_p = probs(ks[4], (65, 141))     # 9165 elems: 8192 main (64 rows) + tail
    big_t = probs(ks[5], (65, 141))
    got2 = jax.block_until_ready(_bce_mean_large(big_p, big_t, block_rows=24))
    want2 = jnp.mean(_bce_terms(big_p, big_t))
    assert jnp.allclose(got2, want2, rtol=1e-5, atol=1e-6), (got2, want2)

    got1 = jax.block_until_ready(_bce_mean_large(big_p, block_rows=24))
    want1 = jnp.mean(_self_bce_terms(big_p))
    assert jnp.allclose(got1, want1, rtol=1e-5, atol=1e-6), (got1, want1)

    print("KERNEL_OK")
</pallas_src>

<mosaic_0001>
module attributes {stable_mosaic.version = 11 : i64} {
  func.func @_fused_sums_kernel(%arg0: memref<4x128xf32, #tpu.memory_space<vmem>>, %arg1: memref<4x128xf32, #tpu.memory_space<vmem>>, %arg2: memref<3x128xf32, #tpu.memory_space<vmem>>, %arg3: memref<1x128xf32, #tpu.memory_space<vmem>>, %arg4: memref<24x128xf32, #tpu.memory_space<vmem>>) attributes {dimension_semantics = [], scalar_prefetch = 0 : i64, scratch_operands = 0 : i64, tpu.core_type = #tpu.core_type<tc>} {
    %cst = arith.constant 0.000000e+00 : f32
    %0 = vector.broadcast %cst : f32 to vector<24x128xf32>
    %c0 = arith.constant 0 : index
    %c0_0 = arith.constant 0 : index
    %1 = vector.load %arg4[%c0, %c0_0] : memref<24x128xf32, #tpu.memory_space<vmem>>, vector<24x128xf32>
    tpu.vector_store %arg4[%c0, %c0_0], %0 {strides = array<i32>} : memref<24x128xf32, #tpu.memory_space<vmem>>, vector<24x128xf32>,
    %c0_1 = arith.constant 0 : index
    %c0_2 = arith.constant 0 : index
    %2 = vector.load %arg0[%c0_1, %c0_2] : memref<4x128xf32, #tpu.memory_space<vmem>>, vector<4x128xf32>
    %c0_3 = arith.constant 0 : index
    %c0_4 = arith.constant 0 : index
    %3 = vector.load %arg1[%c0_3, %c0_4] : memref<4x128xf32, #tpu.memory_space<vmem>>, vector<4x128xf32>
    %4 = math.log %2 : vector<4x128xf32>
    %cst_5 = arith.constant -1.000000e+02 : f32
    %5 = vector.broadcast %cst_5 : f32 to vector<4x128xf32>
    %6 = arith.maximumf %4, %5 : vector<4x128xf32>
    %cst_6 = arith.constant 1.000000e+00 : f32
    %7 = vector.broadcast %cst_6 : f32 to vector<4x128xf32>
    %8 = arith.subf %7, %2 : vector<4x128xf32>
    %9 = math.log %8 : vector<4x128xf32>
    %cst_7 = arith.constant -1.000000e+02 : f32
    %10 = vector.broadcast %cst_7 : f32 to vector<4x128xf32>
    %11 = arith.maximumf %9, %10 : vector<4x128xf32>
    %12 = arith.mulf %3, %6 : vector<4x128xf32>
    %cst_8 = arith.constant 1.000000e+00 : f32
    %13 = vector.broadcast %cst_8 : f32 to vector<4x128xf32>
    %14 = arith.subf %13, %3 : vector<4x128xf32>
    %15 = arith.mulf %14, %11 : vector<4x128xf32>
    %16 = arith.addf %12, %15 : vector<4x128xf32>
    %cst_9 = arith.constant 0.000000e+00 : f32
    %17 = vector.broadcast %cst_9 : f32 to vector<4x128xf32>
    %18 = arith.subf %17, %16 : vector<4x128xf32>
    %cst_10 = arith.constant dense<0.000000e+00> : vector<128xf32>
    %19 = vector.multi_reduction <add>, %18, %cst_10 [0] : vector<4x128xf32> to vector<128xf32>
    %20 = vector.shape_cast %19 : vector<128xf32> to vector<1x128xf32>
    %c0_11 = arith.constant 0 : index
    %c0_12 = arith.constant 0 : index
    %21 = vector.load %arg4[%c0_11, %c0_12] : memref<24x128xf32, #tpu.memory_space<vmem>>, vector<1x128xf32>
    tpu.vector_store %arg4[%c0_11, %c0_12], %20 {strides = array<i32>} : memref<24x128xf32, #tpu.memory_space<vmem>>, vector<1x128xf32>,
    %c0_13 = arith.constant 0 : index
    %c0_14 = arith.constant 0 : index
    %22 = vector.load %arg2[%c0_13, %c0_14] : memref<3x128xf32, #tpu.memory_space<vmem>>, vector<3x128xf32>
    %23 = math.log %22 : vector<3x128xf32>
    %cst_15 = arith.constant -1.000000e+02 : f32
    %24 = vector.broadcast %cst_15 : f32 to vector<3x128xf32>
    %25 = arith.maximumf %23, %24 : vector<3x128xf32>
    %cst_16 = arith.constant 1.000000e+00 : f32
    %26 = vector.broadcast %cst_16 : f32 to vector<3x128xf32>
    %27 = arith.subf %26, %22 : vector<3x128xf32>
    %28 = math.log %27 : vector<3x128xf32>
    %cst_17 = arith.constant -1.000000e+02 : f32
    %29 = vector.broadcast %cst_17 : f32 to vector<3x128xf32>
    %30 = arith.maximumf %28, %29 : vector<3x128xf32>
    %31 = arith.mulf %22, %25 : vector<3x128xf32>
    %cst_18 = arith.constant 1.000000e+00 : f32
    %32 = vector.broadcast %cst_18 : f32 to vector<3x128xf32>
    %33 = arith.subf %32, %22 : vector<3x128xf32>
    %34 = arith.mulf %33, %30 : vector<3x128xf32>
    %35 = arith.addf %31, %34 : vector<3x128xf32>
    %cst_19 = arith.constant 0.000000e+00 : f32
    %36 = vector.broadcast %cst_19 : f32 to vector<3x128xf32>
    %37 = arith.subf %36, %35 : vector<3x128xf32>
    %cst_20 = arith.constant dense<0.000000e+00> : vector<128xf32>
    %38 = vector.multi_reduction <add>, %37, %cst_20 [0] : vector<3x128xf32> to vector<128xf32>
    %39 = vector.shape_cast %38 : vector<128xf32> to vector<1x128xf32>
    %c8 = arith.constant 8 : index
    %c0_21 = arith.constant 0 : index
    %40 = vector.load %arg4[%c8, %c0_21] : memref<24x128xf32, #tpu.memory_space<vmem>>, vector<1x128xf32>
    tpu.vector_store %arg4[%c8, %c0_21], %39 {strides = array<i32>} : memref<24x128xf32, #tpu.memory_space<vmem>>, vector<1x128xf32>,
    %c0_22 = arith.constant 0 : index
    %c0_23 = arith.constant 0 : index
    %41 = vector.load %arg3[%c0_22, %c0_23] : memref<1x128xf32, #tpu.memory_space<vmem>>, vector<1x128xf32>
    %42 = math.log %41 : vector<1x128xf32>
    %cst_24 = arith.constant -1.000000e+02 : f32
    %43 = vector.broadcast %cst_24 : f32 to vector<1x128xf32>
    %44 = arith.maximumf %42, %43 : vector<1x128xf32>
    %cst_25 = arith.constant 1.000000e+00 : f32
    %45 = vector.broadcast %cst_25 : f32 to vector<1x128xf32>
    %46 = arith.subf %45, %41 : vector<1x128xf32>
    %47 = math.log %46 : vector<1x128xf32>
    %cst_26 = arith.constant -1.000000e+02 : f32
    %48 = vector.broadcast %cst_26 : f32 to vector<1x128xf32>
    %49 = arith.maximumf %47, %48 : vector<1x128xf32>
    %50 = arith.mulf %41, %44 : vector<1x128xf32>
    %cst_27 = arith.constant 1.000000e+00 : f32
    %51 = vector.broadcast %cst_27 : f32 to vector<1x128xf32>
    %52 = arith.subf %51, %41 : vector<1x128xf32>
    %53 = arith.mulf %52, %49 : vector<1x128xf32>
    %54 = arith.addf %50, %53 : vector<1x128xf32>
    %cst_28 = arith.constant 0.000000e+00 : f32
    %55 = vector.broadcast %cst_28 : f32 to vector<1x128xf32>
    %56 = arith.subf %55, %54 : vector<1x128xf32>
    %cst_29 = arith.constant dense<0.000000e+00> : vector<128xf32>
    %57 = vector.multi_reduction <add>, %56, %cst_29 [0] : vector<1x128xf32> to vector<128xf32>
    %58 = vector.shape_cast %57 : vector<128xf32> to vector<1x128xf32>
    %c16 = arith.constant 16 : index
    %c0_30 = arith.constant 0 : index
    %59 = vector.load %arg4[%c16, %c0_30] : memref<24x128xf32, #tpu.memory_space<vmem>>, vector<1x128xf32>
    tpu.vector_store %arg4[%c16, %c0_30], %58 {strides = array<i32>} : memref<24x128xf32, #tpu.memory_space<vmem>>, vector<1x128xf32>,
    return
  }
}

</mosaic_0001>

<bundles_post_ra>
// kernel: tpu_custom_call.1
= control target key start
LH: loop header
LB: loop body
LE: loop exit
PB: predicated region body
PF: predicated region fallthrough
CT: control target
= control target key end

     0   :  { %9 = vsyncpa [#allocation3], 0  ;;  %s284_s0 = inlined_call_operand.hbm [shape: f32[4,128], index: 0, kind: input, shape index: {}]   ;;  %s285_s1 = inlined_call_operand.hbm [shape: f32[4,128], index: 1, kind: input, shape index: {}]   ;;  %s286_s2 = inlined_call_operand.vmem [shape: f32[3,128], index: 2, kind: input, shape index: {}]   ;;  %s287_s3 = inlined_call_operand.vmem [shape: f32[1,128], index: 3, kind: input, shape index: {}]   ;;  %s288_s4 = inlined_call_operand.hbm [shape: f32[24,128], index: 4, kind: output, shape index: {}]  }
   0x1   :  { %10 = vsyncpa [#allocation6], 0 }
   0x2   :  { %11 = vsyncpa [#allocation4], 0  ;;  %s211_s15 = smov [#allocation2]   ;;  %s212_s17 = smov [#allocation5]  }
   0x3   :  { %s18_s16 = sshll.u32 %s211_s15, 4  ;;  %s28_s18 = sshll.u32 %s212_s17, 4  ;;  %s19_s16 = int_to_ptr.vmem [resolvable:$true] %s18_s16  ;;  %s29_s18 = int_to_ptr.vmem [resolvable:$true] %s28_s18 }
   0x4   :  { %s139_s21 = scalar_lea.hbm %s284_s0, 64 }
   0x5   :  { %p140_p0 = scmp.ne.s32.totalorder %s284_s0, %s139_s21  ;;  %p143_p1 = scmp.lt.u32.totalorder %s139_s21, %s284_s0 }
   0x7   :  { %p145_p2 = pnand %p143_p1, %p140_p0 }
   0x9   :  { %148 = shalt.err (!%p145_p2)
}
   0xa   :  { %s149_s26 = scalar_lea.vmem %s19_s16, 64  ;;  %p154_p4 = scmp.lt.s32.totalorder %s19_s16, %s19_s16 }
   0xb   :  { %p150_p3 = scmp.ne.s32.totalorder %s19_s16, %s149_s26  ;;  %p155_p5 = scmp.lt.s32.totalorder %s149_s26, %s149_s26 }
   0xd   :  { %p156_p6 = por %p155_p5, %p154_p4 }
   0xf   :  { %p157_p7 = pnand %p156_p6, %p150_p3 }
  0x11   :  { %160 = shalt.err (!%p157_p7)
}
  0x12   :  { %21 = dma.hbm_to_vmem [thread:$0]  %s284_s0, 64, %s19_s16, [#allocation3]  }
  0x13   :  { %s161_s5 = scalar_lea.hbm %s285_s1, 64 }
  0x14   :  { %p162_p8 = scmp.ne.s32.totalorder %s285_s1, %s161_s5  ;;  %p165_p9 = scmp.lt.u32.totalorder %s161_s5, %s285_s1 }
  0x16   :  { %p167_p10 = pnand %p165_p9, %p162_p8 }
  0x18   :  { %170 = shalt.err (!%p167_p10)
}
  0x19   :  { %s171_s10 = scalar_lea.vmem %s29_s18, 64  ;;  %p176_p12 = scmp.lt.s32.totalorder %s29_s18, %s29_s18 }
  0x1a   :  { %p172_p11 = scmp.ne.s32.totalorder %s29_s18, %s171_s10  ;;  %p177_p13 = scmp.lt.s32.totalorder %s171_s10, %s171_s10 }
  0x1c   :  { %p178_p0 = por %p177_p13, %p176_p12 }
  0x1e   :  { %p179_p1 = pnand %p178_p0, %p172_p11 }
  0x20   :  { %182 = shalt.err (!%p179_p1)
}
  0x21   :  { %31 = dma.hbm_to_vmem [thread:$0]  %s285_s1, 64, %s29_s18, [#allocation6]  }
  0x22   :  { %205 = dma.done.wait [#allocation3], 64  }
  0x23   :  { %206 = vsyncadd [#allocation3], 4294967232 }
  0x24   :  { %207 = dma.done.wait [#allocation6], 64  }
  0x25   :  { %208 = vsyncadd [#allocation6], 4294967232  ;;  %v213_v0 = vmov 0.0   ;;  %v45_v1 = vld [vmem:[#allocation2] sm:$0xf]  ;;  %vm59_vm0 = vcmask 1043456  }
  0x26   :  { %42 = vst [vmem:[#allocation7] sm:$0xff] %v213_v0  ;;  %43 = vst [vmem:[#allocation7 + $0x8] sm:$0xff] %v213_v0  ;;  %v68_v2 = vld [vmem:[%s286_s2] sm:$0x7]  ;;  %127 = vlog2.f32 %v45_v1  ;;  %v50_v3 = vsub.f32 1.0, %v45_v1  ;;  %vm80_vm1 = vcmask 1042432  }
  0x27   :  { %44 = vst [vmem:[#allocation7 + $0x10] sm:$0xff] %v213_v0  ;;  %v72_v4 = vsub.f32 1.0, %v68_v2  ;;  %v89_v5 = vld [vmem:[%s287_s3] sm:$0x1]  ;;  %129 = vlog2.f32 %v68_v2  ;;  %v46_v8 = vld [vmem:[#allocation5] sm:$0xf] }
  0x28   :  { %v93_v6 = vsub.f32 1.0, %v89_v5  ;;  %131 = vlog2.f32 %v50_v3  ;;  %v55_v16 = vsub.f32 1.0, %v46_v8  ;;  %s214_s1 = smov [#allocation7]  }
  0x29   :  { %133 = vlog2.f32 %v72_v4  ;;  %s108_s2 = sshll.u32 %s214_s1, 4  ;;  %s109_s2 = int_to_ptr.vmem [resolvable:$true] %s108_s2 }
  0x2a   :  { %135 = vlog2.f32 %v89_v5  ;;  %s183_s3 = scalar_lea.vmem %s109_s2, 384  ;;  %p188_p3 = scmp.lt.s32.totalorder %s109_s2, %s109_s2 }
  0x2b   :  { %137 = vlog2.f32 %v93_v6  ;;  %p184_p2 = scmp.ne.s32.totalorder %s109_s2, %s183_s3  ;;  %p189_p4 = scmp.lt.s32.totalorder %s183_s3, %s183_s3 }
  0x2d   :  { %p190_p5 = por %p189_p4, %p188_p3 }
  0x2f   :  { %p191_p6 = pnand %p190_p5, %p184_p2 }
  0x30   :  { %v128_v7 = vpop.eup %127 }
  0x31   :  { %v130_v9 = vpop.eup %129  ;;  %v48_v10 = vmul.f32 0.6931472, %v128_v7 }
  0x32   :  { %v132_v11 = vpop.eup %131  ;;  %v70_v12 = vmul.f32 0.6931472, %v130_v9 }
  0x33   :  { %v134_v13 = vpop.eup %133  ;;  %v49_v14 = vmax.f32 %v48_v10, -100.0  ;;  %v52_v15 = vmul.f32 0.6931472, %v132_v11 }
  0x34   :  { %v136_v17 = vpop.eup %135  ;;  %v71_v18 = vmax.f32 %v70_v12, -100.0  ;;  %v74_v19 = vmul.f32 0.6931472, %v134_v13 }
  0x35   :  { %v138_v20 = vpop.eup %137  ;;  %v53_v21 = vmax.f32 %v52_v15, -100.0  ;;  %v54_v22 = vmul.f32 %v49_v14, %v46_v8  ;;  %v91_v23 = vmul.f32 0.6931472, %v136_v17 }
  0x36   :  { %v75_v24 = vmax.f32 %v74_v19, -100.0  ;;  %v76_v25 = vmul.f32 %v71_v18, %v68_v2  ;;  %v95_v26 = vmul.f32 0.6931472, %v138_v20 }
  0x37   :  { %v56_v27 = vmul.f32 %v55_v16, %v53_v21  ;;  %v92_v28 = vmax.f32 %v91_v23, -100.0 }
  0x38   :  { %v77_v29 = vmul.f32 %v75_v24, %v72_v4  ;;  %v96_v30 = vmax.f32 %v95_v26, -100.0 }
  0x39   :  { %v57_v31 = vadd.f32 %v56_v27, %v54_v22  ;;  %v97_v32 = vmul.f32 %v92_v28, %v89_v5 }
  0x3a   :  { %v78_v33 = vadd.f32 %v77_v29, %v76_v25  ;;  %v98_v34 = vmul.f32 %v96_v30, %v93_v6 }
  0x3b   :  { %v58_v35 = vsub.f32 0.0, %v57_v31 }
  0x3c   :  { %v79_v36 = vsub.f32 0.0, %v78_v33  ;;  %v99_v37 = vadd.f32 %v98_v34, %v97_v32 }
  0x3d   :  { %v60_v38 = vsel %vm59_vm0, %v58_v35, 0.0 }
  0x3e   :  { %v61_v39 = vrot.slane %v60_v38, 4  ;;  %v81_v40 = vsel %vm80_vm1, %v79_v36, 0.0  ;;  %v100_v41 = vsub.f32 0.0, %v99_v37 }
  0x3f   :  { %v82_v42 = vrot.slane %v81_v40, 4 }
  0x40   :  { %v62_v43 = vadd.f32 %v61_v39, %v60_v38  ;;  %102 = vst [vmem:[#allocation7 + $0x10] sm:$0x1] %v100_v41 }
  0x41   :  { %v83_v44 = vadd.f32 %v82_v42, %v81_v40 }
  0x42   :  { %v63_v45 = vrot.slane %v62_v43, 2 }
  0x43   :  { %v84_v46 = vrot.slane %v83_v44, 2 }
  0x44   :  { %v64_v47 = vadd.f32 %v63_v45, %v62_v43 }
  0x45   :  { %v85_v48 = vadd.f32 %v84_v46, %v83_v44 }
  0x46   :  { %v65_v49 = vrot.slane %v64_v47, 1 }
  0x47   :  { %v86_v50 = vrot.slane %v85_v48, 1 }
  0x48   :  { %v66_v51 = vadd.f32 %v65_v49, %v64_v47 }
  0x49   :  { %v87_v52 = vadd.f32 %v86_v50, %v85_v48 }
  0x4a   :  { %67 = vst [vmem:[#allocation7] sm:$0x1] %v66_v51 }
  0x4b   :  { %88 = vst [vmem:[#allocation7 + $0x8] sm:$0x1] %v87_v52 }
  0x4c   :  { %194 = shalt.err (!%p191_p6)
}
  0x4d   :  { %s195_s18 = scalar_lea.hbm %s288_s4, 384 }
  0x4e   :  { %p196_p7 = scmp.ne.s32.totalorder %s288_s4, %s195_s18  ;;  %p199_p8 = scmp.lt.u32.totalorder %s195_s18, %s288_s4 }
  0x50   :  { %p201_p9 = pnand %p199_p8, %p196_p7 }
  0x52   :  { %204 = shalt.err (!%p201_p9)
}
  0x53   :  { %s215_s23 = smov 128   ;;  %s216_s24 = smov 8  }
  0x54   :  { %114 = dma.vmem_to_hbm [thread:$0]  %s109_s2, 384, %s288_s4, [#allocation4], %s215_s23, %s215_s23, %s216_s24  }
  0x55   :  { %209 = dma.done.wait [#allocation4], 384  }
  0x56   :  { %210 = vsyncadd [#allocation4], 4294966912 }
  0x57   :  { %118 = vsyncpa [#allocation3], 1 }
  0x58   :  { %119 = vsyncpa [#allocation6], 1 }
  0x59   :  { %120 = vsyncpa [#allocation4], 1 }

</bundles_post_ra>
